<compile_context>
chip_gen: v6e
topology: v6e:2x2x1
jax: 0.10.0
libtpu: 0.0.40
codegen_flags: <defaults>
</compile_context>

<pallas_src>
import functools
import math

import jax
import jax.numpy as jnp
from jax.experimental import pallas as pl
from jax.experimental.pallas import tpu as pltpu

_LANE = 128


def _round_up(x, m):
    return ((x + m - 1) // m) * m


def _fold_rows(x, out_rows=8):
    """(SUB, L) -> (out_rows, L) by summing sublane-aligned row groups (dense VPU adds)."""
    sub = x.shape[0]
    acc = x[0:out_rows]
    for r in range(out_rows, sub, out_rows):
        acc = acc + x[r:r + out_rows]
    return acc


def _adaptive_bc_kernel(p_ref, t_ref, num_ref, den_ref, *,
                        prob_thr, ln_gamma, category_weights, hw, inner_steps):
    inner = pl.program_id(2)

    # Zero the per-(batch, hw-split) resident accumulators on the first step.
    @pl.when(inner == 0)
    def _():
        num_ref[...] = jnp.zeros_like(num_ref)
        den_ref[...] = jnp.zeros_like(den_ref)

    p = p_ref[...].astype(jnp.float32)              # (C, SUB, 128) logits
    t = t_ref[...]                                  # (SUB, 128) int32 labels
    c, sub, lanes = p.shape

    # Channel softmax pieces: reductions over the leading (non-tiled) channel
    # dim are c-1 dense VPU ops over full (SUB, 128) vregs.
    p_max = jnp.max(p, axis=0)                      # (SUB, 128)
    e = jnp.exp(p - p_max[None])                    # (C, SUB, 128)
    s = jnp.sum(e, axis=0)                          # (SUB, 128)
    log_s = jnp.log(s)

    # Target-class logit + per-class weight via one trace-time select chain
    # (fused one-hot: no f32 one-hot tensor, (t == j) compare reused; classes
    # with weight 1.0 skipped).
    tgt_logit = jnp.zeros_like(p_max)
    tw = jnp.ones_like(p_max)
    for j in range(c):
        sel = t == j
        tgt_logit = jnp.where(sel, p[j], tgt_logit)
        cw = float(category_weights[j]) if j < len(category_weights) else 1.0
        if cw != 1.0:
            tw = jnp.where(sel, jnp.float32(cw), tw)

    ce = log_s + p_max - tgt_logit                  # -log softmax[target]

    # "target_probs" per the module as written == probability of class 0.
    # Divide-free: exact multiply-compare for the threshold; exp(p0-pmax-log s)
    # (EUP slot, reuses log_s) for the exponent term.
    cls0_prob = jnp.exp(p[0] - p_max - log_s)
    mask = e[0] < jnp.float32(prob_thr) * s         # == (cls0_prob < prob_thr)

    expo = tw - cls0_prob
    if ln_gamma != 1.0:                             # gamma == e -> skip the mul
        expo = jnp.float32(ln_gamma) * expo
    w = jnp.where(mask, jnp.exp(expo), jnp.float32(0.0))

    # Mask ragged tail / wrapper padding / clamped overshoot blocks.  All ops
    # above are lane-local, so garbage pixels only poison themselves and are
    # zeroed here *before* any reduction.
    block_idx = pl.program_id(1) * inner_steps + inner
    row = jax.lax.broadcasted_iota(jnp.int32, (sub, lanes), 0)
    lane = jax.lax.broadcasted_iota(jnp.int32, (sub, lanes), 1)
    valid = (block_idx * sub + row) * lanes + lane < hw

    wce = jnp.where(valid, w * ce, 0.0)
    wv = jnp.where(valid, w, 0.0)

    # Collapse only sublane groups (dense adds); the final scalar reduce of the
    # (8, 128) accumulators happens once in the wrapper.
    num_ref[...] += _fold_rows(wce)
    den_ref[...] += _fold_rows(wv)


def adaptive_bc_loss(preds, targets, beta=1.0, gamma=math.e, prob_thr=0.95,
                     smooth=1, category_weights=(1.0, 2.0, 1.0, 2.0, 1.0),
                     loss_name="sup_ce_loss", rows_per_step=256, hw_splits=None):
    """preds: (N, C, H, W) logits (f32 or bf16); targets: (N, H, W) class ids.

    `beta` / `smooth` are unused by the reference forward (it hard-codes +1.0
    in the denominator); kept only for API parity with the PyTorch module.
    """
    n, c, h, w = preds.shape
    hw = h * w

    # NCHW -> (N, C, G, 128) and (N, G, 128): contiguous reshapes, no transpose.
    # Pad only in the rare case HW % 128 != 0; padded pixels are masked in-kernel.
    hw_pad = _round_up(hw, _LANE)
    p3 = preds.reshape(n, c, hw)
    t3 = targets.reshape(n, hw).astype(jnp.int32)
    if hw_pad != hw:
        p3 = jnp.pad(p3, ((0, 0), (0, 0), (0, hw_pad - hw)))
        t3 = jnp.pad(t3, ((0, 0), (0, hw_pad - hw)))
    g_total = hw_pad // _LANE
    p4 = p3.reshape(n, c, g_total, _LANE)
    t4 = t3.reshape(n, g_total, _LANE)

    # Rows (of 128 pixels) per grid step: default 256 rows == 32768 px/step,
    # shrunk for large C so double-buffered inputs + f32 intermediates stay
    # within a ~24 MiB working set (safe under v7x's 64 MiB physical VMEM).
    itemsize = jnp.dtype(preds.dtype).itemsize
    bytes_per_row = _LANE * (2 * c * itemsize + 2 * 4 + (2 * c + 12) * 4)
    vmem_rows = max(8, int((24 * 1024 * 1024) // bytes_per_row))
    sub = min(int(rows_per_step), vmem_rows, _round_up(g_total, 8))
    sub = max(8, (sub // 8) * 8)

    g_blocks = pl.cdiv(g_total, sub)

    # Parallel split of the HW axis: keeps both v7x TensorCores busy when N is
    # too small to fill the (parallel) batch axis.  No effect on v5e/v6e.
    if hw_splits is None:
        hw_splits = 2 if n == 1 else 1
    n_outer = max(1, min(int(hw_splits), g_blocks))
    inner_steps = pl.cdiv(g_blocks, n_outer)

    def block_of(o, i):
        # Clamp so auto-DMA never indexes past the array; any overshoot step is
        # fully masked in-kernel via the `valid` predicate (pix >= hw).
        return jnp.minimum(o * inner_steps + i, g_blocks - 1)

    kernel = functools.partial(
        _adaptive_bc_kernel,
        prob_thr=float(prob_thr),
        ln_gamma=float(math.log(gamma)),
        category_weights=tuple(float(x) for x in category_weights),
        hw=hw,
        inner_steps=inner_steps,
    )

    num, den = pl.pallas_call(
        kernel,
        out_shape=(
            jax.ShapeDtypeStruct((n, n_outer, 8, _LANE), jnp.float32),
            jax.ShapeDtypeStruct((n, n_outer, 8, _LANE), jnp.float32),
        ),
        grid_spec=pltpu.PrefetchScalarGridSpec(
            num_scalar_prefetch=0,
            grid=(n, n_outer, inner_steps),
            in_specs=[
                pl.BlockSpec((None, c, sub, _LANE),
                             lambda b, o, i: (b, 0, block_of(o, i), 0)),
                pl.BlockSpec((None, sub, _LANE),
                             lambda b, o, i: (b, block_of(o, i), 0)),
            ],
            out_specs=[
                pl.BlockSpec((None, None, 8, _LANE), lambda b, o, i: (b, o, 0, 0)),
                pl.BlockSpec((None, None, 8, _LANE), lambda b, o, i: (b, o, 0, 0)),
            ],
        ),
        compiler_params=pltpu.CompilerParams(
            dimension_semantics=("parallel", "parallel", "arbitrary"),
            vmem_limit_bytes=48 * 1024 * 1024,
        ),
    )(p4, t4)

    loss = num.sum() / (den.sum() + jnp.float32(1.0))
    return {loss_name: loss}


def _reference(preds, targets, gamma=math.e, prob_thr=0.95,
               category_weights=(1.0, 2.0, 1.0, 2.0, 1.0)):
    """Pure-JAX mirror of the PyTorch forward (as written)."""
    probs = jax.nn.softmax(preds, axis=1)
    # scatter_(dim=1, index=targets[:,None], src=probs).sum(1) == probs[:, 0]
    target_probs = probs[:, 0]
    masks = (target_probs < prob_thr).astype(jnp.float32)
    tw = jnp.ones_like(target_probs)
    for cls_id, cw in enumerate(category_weights):
        tw = jnp.where(targets == cls_id, jnp.float32(cw), tw)
    weights = masks * jnp.power(jnp.float32(gamma), tw - target_probs)
    logp = jax.nn.log_softmax(preds, axis=1)
    ce = -jnp.take_along_axis(logp, targets[:, None], axis=1)[:, 0]
    return (weights * ce).sum() / (weights.sum() + 1.0)


if __name__ == "__main__":
    key = jax.random.PRNGKey(0)
    k1, k2 = jax.random.split(key)
    # Small shapes consistent with the module: batch=2, channels=5 (matches the
    # 5-entry default category_weights), spatial=16x16.
    preds = jax.random.normal(k1, (2, 5, 16, 16), dtype=jnp.float32)
    targets = jax.random.randint(k2, (2, 16, 16), 0, 5, dtype=jnp.int32)

    out = adaptive_bc_loss(preds, targets)
    loss = jax.block_until_ready(out["sup_ce_loss"])

    ref = _reference(preds, targets)
    assert jnp.allclose(loss, ref, rtol=1e-4, atol=1e-5), (loss, ref)
    print("KERNEL_OK")
</pallas_src>

<mosaic_0001>
module attributes {stable_mosaic.version = 11 : i64} {
  func.func @_adaptive_bc_kernel(%arg0: i32, %arg1: i32, %arg2: i32, %arg3: memref<1x5x8x128xf32, #tpu.memory_space<vmem>>, %arg4: memref<1x8x128xi32, #tpu.memory_space<vmem>>, %arg5: memref<1x1x8x128xf32, #tpu.memory_space<vmem>>, %arg6: memref<1x1x8x128xf32, #tpu.memory_space<vmem>>) attributes {dimension_semantics = [#tpu.dimension_semantics<parallel>, #tpu.dimension_semantics<parallel>, #tpu.dimension_semantics<arbitrary>], iteration_bounds = array<i64: 2, 1, 1>, scalar_prefetch = 0 : i64, scratch_operands = 0 : i64, tpu.core_type = #tpu.core_type<tc>, window_params = [{transform_indices = @transform_0, window_bounds = array<i64: 1, 5, 8, 128>}, {transform_indices = @transform_1, window_bounds = array<i64: 1, 8, 128>}, {transform_indices = @transform_2, window_bounds = array<i64: 1, 1, 8, 128>}, {transform_indices = @transform_3, window_bounds = array<i64: 1, 1, 8, 128>}]} {
    %c0_i32 = arith.constant 0 : i32
    %0 = arith.cmpi eq, %arg2, %c0_i32 : i32
    %1 = arith.extui %0 : i1 to i32
    %c0_i32_0 = arith.constant 0 : i32
    %2 = arith.cmpi ne, %1, %c0_i32_0 : i32
    scf.if %2 {
      %cst_34 = arith.constant 0.000000e+00 : f32
      %90 = vector.broadcast %cst_34 : f32 to vector<8x128xf32>
      %c0_35 = arith.constant 0 : index
      %c0_36 = arith.constant 0 : index
      %c0_37 = arith.constant 0 : index
      %c0_38 = arith.constant 0 : index
      %91 = vector.load %arg5[%c0_35, %c0_36, %c0_37, %c0_38] : memref<1x1x8x128xf32, #tpu.memory_space<vmem>>, vector<1x1x8x128xf32>
      %92 = vector.shape_cast %91 : vector<1x1x8x128xf32> to vector<8x128xf32>
      %93 = vector.shape_cast %90 : vector<8x128xf32> to vector<1x1x8x128xf32>
      tpu.vector_store %arg5[%c0_35, %c0_36, %c0_37, %c0_38], %93 {strides = array<i32>} : memref<1x1x8x128xf32, #tpu.memory_space<vmem>>, vector<1x1x8x128xf32>,
      %cst_39 = arith.constant 0.000000e+00 : f32
      %94 = vector.broadcast %cst_39 : f32 to vector<8x128xf32>
      %c0_40 = arith.constant 0 : index
      %c0_41 = arith.constant 0 : index
      %c0_42 = arith.constant 0 : index
      %c0_43 = arith.constant 0 : index
      %95 = vector.load %arg6[%c0_40, %c0_41, %c0_42, %c0_43] : memref<1x1x8x128xf32, #tpu.memory_space<vmem>>, vector<1x1x8x128xf32>
      %96 = vector.shape_cast %95 : vector<1x1x8x128xf32> to vector<8x128xf32>
      %97 = vector.shape_cast %94 : vector<8x128xf32> to vector<1x1x8x128xf32>
      tpu.vector_store %arg6[%c0_40, %c0_41, %c0_42, %c0_43], %97 {strides = array<i32>} : memref<1x1x8x128xf32, #tpu.memory_space<vmem>>, vector<1x1x8x128xf32>,
    } else {
    }
    %c0 = arith.constant 0 : index
    %c0_1 = arith.constant 0 : index
    %c0_2 = arith.constant 0 : index
    %c0_3 = arith.constant 0 : index
    %3 = vector.load %arg3[%c0, %c0_1, %c0_2, %c0_3] : memref<1x5x8x128xf32, #tpu.memory_space<vmem>>, vector<1x5x8x128xf32>
    %4 = vector.shape_cast %3 : vector<1x5x8x128xf32> to vector<5x8x128xf32>
    %c0_4 = arith.constant 0 : index
    %c0_5 = arith.constant 0 : index
    %c0_6 = arith.constant 0 : index
    %5 = vector.load %arg4[%c0_4, %c0_5, %c0_6] : memref<1x8x128xi32, #tpu.memory_space<vmem>>, vector<1x8x128xi32>
    %6 = vector.shape_cast %5 : vector<1x8x128xi32> to vector<8x128xi32>
    %cst = arith.constant dense<0xFF800000> : vector<8x128xf32>
    %7 = vector.multi_reduction <maximumf>, %4, %cst [0] : vector<5x8x128xf32> to vector<8x128xf32>
    %8 = vector.shape_cast %7 : vector<8x128xf32> to vector<1x8x128xf32>
    %9 = vector.broadcast %8 : vector<1x8x128xf32> to vector<5x8x128xf32>
    %10 = arith.subf %4, %9 : vector<5x8x128xf32>
    %11 = math.exp %10 : vector<5x8x128xf32>
    %cst_7 = arith.constant dense<0.000000e+00> : vector<8x128xf32>
    %12 = vector.multi_reduction <add>, %11, %cst_7 [0] : vector<5x8x128xf32> to vector<8x128xf32>
    %13 = math.log %12 : vector<8x128xf32>
    %cst_8 = arith.constant 0.000000e+00 : f32
    %14 = vector.broadcast %cst_8 : f32 to vector<8x128xf32>
    %cst_9 = arith.constant 1.000000e+00 : f32
    %15 = vector.broadcast %cst_9 : f32 to vector<8x128xf32>
    %c0_i32_10 = arith.constant 0 : i32
    %16 = vector.broadcast %c0_i32_10 : i32 to vector<8x128xi32>
    %17 = arith.cmpi eq, %6, %16 : vector<8x128xi32>
    %18 = vector.extract_strided_slice %4 {offsets = [0, 0, 0], sizes = [1, 8, 128], strides = [1, 1, 1]} : vector<5x8x128xf32> to vector<1x8x128xf32>
    %19 = vector.shape_cast %18 : vector<1x8x128xf32> to vector<8x128xf32>
    %20 = arith.select %17, %19, %14 : vector<8x128xi1>, vector<8x128xf32>
    %c1_i32 = arith.constant 1 : i32
    %21 = vector.broadcast %c1_i32 : i32 to vector<8x128xi32>
    %22 = arith.cmpi eq, %6, %21 : vector<8x128xi32>
    %23 = vector.extract_strided_slice %4 {offsets = [1, 0, 0], sizes = [1, 8, 128], strides = [1, 1, 1]} : vector<5x8x128xf32> to vector<1x8x128xf32>
    %24 = vector.shape_cast %23 : vector<1x8x128xf32> to vector<8x128xf32>
    %25 = arith.select %22, %24, %20 : vector<8x128xi1>, vector<8x128xf32>
    %cst_11 = arith.constant 2.000000e+00 : f32
    %26 = vector.broadcast %cst_11 : f32 to vector<8x128xf32>
    %27 = arith.select %22, %26, %15 : vector<8x128xi1>, vector<8x128xf32>
    %c2_i32 = arith.constant 2 : i32
    %28 = vector.broadcast %c2_i32 : i32 to vector<8x128xi32>
    %29 = arith.cmpi eq, %6, %28 : vector<8x128xi32>
    %30 = vector.extract_strided_slice %4 {offsets = [2, 0, 0], sizes = [1, 8, 128], strides = [1, 1, 1]} : vector<5x8x128xf32> to vector<1x8x128xf32>
    %31 = vector.shape_cast %30 : vector<1x8x128xf32> to vector<8x128xf32>
    %32 = arith.select %29, %31, %25 : vector<8x128xi1>, vector<8x128xf32>
    %c3_i32 = arith.constant 3 : i32
    %33 = vector.broadcast %c3_i32 : i32 to vector<8x128xi32>
    %34 = arith.cmpi eq, %6, %33 : vector<8x128xi32>
    %35 = vector.extract_strided_slice %4 {offsets = [3, 0, 0], sizes = [1, 8, 128], strides = [1, 1, 1]} : vector<5x8x128xf32> to vector<1x8x128xf32>
    %36 = vector.shape_cast %35 : vector<1x8x128xf32> to vector<8x128xf32>
    %37 = arith.select %34, %36, %32 : vector<8x128xi1>, vector<8x128xf32>
    %cst_12 = arith.constant 2.000000e+00 : f32
    %38 = vector.broadcast %cst_12 : f32 to vector<8x128xf32>
    %39 = arith.select %34, %38, %27 : vector<8x128xi1>, vector<8x128xf32>
    %c4_i32 = arith.constant 4 : i32
    %40 = vector.broadcast %c4_i32 : i32 to vector<8x128xi32>
    %41 = arith.cmpi eq, %6, %40 : vector<8x128xi32>
    %42 = vector.extract_strided_slice %4 {offsets = [4, 0, 0], sizes = [1, 8, 128], strides = [1, 1, 1]} : vector<5x8x128xf32> to vector<1x8x128xf32>
    %43 = vector.shape_cast %42 : vector<1x8x128xf32> to vector<8x128xf32>
    %44 = arith.select %41, %43, %37 : vector<8x128xi1>, vector<8x128xf32>
    %45 = arith.addf %13, %7 : vector<8x128xf32>
    %46 = arith.subf %45, %44 : vector<8x128xf32>
    %47 = vector.extract_strided_slice %4 {offsets = [0, 0, 0], sizes = [1, 8, 128], strides = [1, 1, 1]} : vector<5x8x128xf32> to vector<1x8x128xf32>
    %48 = vector.shape_cast %47 : vector<1x8x128xf32> to vector<8x128xf32>
    %49 = arith.subf %48, %7 : vector<8x128xf32>
    %50 = arith.subf %49, %13 : vector<8x128xf32>
    %51 = math.exp %50 : vector<8x128xf32>
    %52 = vector.extract_strided_slice %11 {offsets = [0, 0, 0], sizes = [1, 8, 128], strides = [1, 1, 1]} : vector<5x8x128xf32> to vector<1x8x128xf32>
    %53 = vector.shape_cast %52 : vector<1x8x128xf32> to vector<8x128xf32>
    %cst_13 = arith.constant 0.949999988 : f32
    %54 = vector.broadcast %cst_13 : f32 to vector<8x128xf32>
    %55 = arith.mulf %54, %12 : vector<8x128xf32>
    %56 = arith.cmpf olt, %53, %55 : vector<8x128xf32>
    %57 = arith.subf %39, %51 : vector<8x128xf32>
    %58 = math.exp %57 : vector<8x128xf32>
    %cst_14 = arith.constant 0.000000e+00 : f32
    %59 = vector.broadcast %cst_14 : f32 to vector<8x128xf32>
    %60 = arith.select %56, %58, %59 : vector<8x128xi1>, vector<8x128xf32>
    %c1_i32_15 = arith.constant 1 : i32
    %61 = arith.muli %arg1, %c1_i32_15 : i32
    %62 = arith.addi %61, %arg2 : i32
    %63 = tpu.iota {dimensions = array<i32: 0>} : vector<8x128xi32>
    %64 = tpu.iota {dimensions = array<i32: 1>} : vector<8x128xi32>
    %c8_i32 = arith.constant 8 : i32
    %65 = arith.muli %62, %c8_i32 : i32
    %66 = vector.broadcast %65 : i32 to vector<8x128xi32>
    %67 = arith.addi %66, %63 : vector<8x128xi32>
    %c128_i32 = arith.constant 128 : i32
    %68 = vector.broadcast %c128_i32 : i32 to vector<8x128xi32>
    %69 = arith.muli %67, %68 : vector<8x128xi32>
    %70 = arith.addi %69, %64 : vector<8x128xi32>
    %c256_i32 = arith.constant 256 : i32
    %71 = vector.broadcast %c256_i32 : i32 to vector<8x128xi32>
    %72 = arith.cmpi slt, %70, %71 : vector<8x128xi32>
    %73 = arith.mulf %60, %46 : vector<8x128xf32>
    %cst_16 = arith.constant 0.000000e+00 : f32
    %74 = vector.broadcast %cst_16 : f32 to vector<8x128xf32>
    %75 = arith.select %72, %73, %74 : vector<8x128xi1>, vector<8x128xf32>
    %cst_17 = arith.constant 0.000000e+00 : f32
    %76 = vector.broadcast %cst_17 : f32 to vector<8x128xf32>
    %77 = arith.select %72, %60, %76 : vector<8x128xi1>, vector<8x128xf32>
    %c0_18 = arith.constant 0 : index
    %c0_19 = arith.constant 0 : index
    %c0_20 = arith.constant 0 : index
    %c0_21 = arith.constant 0 : index
    %78 = vector.load %arg5[%c0_18, %c0_19, %c0_20, %c0_21] : memref<1x1x8x128xf32, #tpu.memory_space<vmem>>, vector<1x1x8x128xf32>
    %79 = vector.shape_cast %78 : vector<1x1x8x128xf32> to vector<8x128xf32>
    %80 = arith.addf %79, %75 : vector<8x128xf32>
    %c0_22 = arith.constant 0 : index
    %c0_23 = arith.constant 0 : index
    %c0_24 = arith.constant 0 : index
    %c0_25 = arith.constant 0 : index
    %81 = vector.load %arg5[%c0_22, %c0_23, %c0_24, %c0_25] : memref<1x1x8x128xf32, #tpu.memory_space<vmem>>, vector<1x1x8x128xf32>
    %82 = vector.shape_cast %81 : vector<1x1x8x128xf32> to vector<8x128xf32>
    %83 = vector.shape_cast %80 : vector<8x128xf32> to vector<1x1x8x128xf32>
    tpu.vector_store %arg5[%c0_22, %c0_23, %c0_24, %c0_25], %83 {strides = array<i32>} : memref<1x1x8x128xf32, #tpu.memory_space<vmem>>, vector<1x1x8x128xf32>,
    %c0_26 = arith.constant 0 : index
    %c0_27 = arith.constant 0 : index
    %c0_28 = arith.constant 0 : index
    %c0_29 = arith.constant 0 : index
    %84 = vector.load %arg6[%c0_26, %c0_27, %c0_28, %c0_29] : memref<1x1x8x128xf32, #tpu.memory_space<vmem>>, vector<1x1x8x128xf32>
    %85 = vector.shape_cast %84 : vector<1x1x8x128xf32> to vector<8x128xf32>
    %86 = arith.addf %85, %77 : vector<8x128xf32>
    %c0_30 = arith.constant 0 : index
    %c0_31 = arith.constant 0 : index
    %c0_32 = arith.constant 0 : index
    %c0_33 = arith.constant 0 : index
    %87 = vector.load %arg6[%c0_30, %c0_31, %c0_32, %c0_33] : memref<1x1x8x128xf32, #tpu.memory_space<vmem>>, vector<1x1x8x128xf32>
    %88 = vector.shape_cast %87 : vector<1x1x8x128xf32> to vector<8x128xf32>
    %89 = vector.shape_cast %86 : vector<8x128xf32> to vector<1x1x8x128xf32>
    tpu.vector_store %arg6[%c0_30, %c0_31, %c0_32, %c0_33], %89 {strides = array<i32>} : memref<1x1x8x128xf32, #tpu.memory_space<vmem>>, vector<1x1x8x128xf32>,
    return
  }
  func.func @transform_0(%arg0: i32, %arg1: i32, %arg2: i32) -> (i32, i32, i32, i32) {
    %c1_i32 = arith.constant 1 : i32
    %0 = arith.muli %arg1, %c1_i32 : i32
    %1 = arith.addi %0, %arg2 : i32
    %c0_i32 = arith.constant 0 : i32
    %2 = arith.minsi %1, %c0_i32 : i32
    %c0_i32_0 = arith.constant 0 : i32
    %c0_i32_1 = arith.constant 0 : i32
    %c0_i32_2 = arith.constant 0 : i32
    return %arg0, %c0_i32_0, %2, %c0_i32_1 : i32, i32, i32, i32
  }
  func.func @transform_1(%arg0: i32, %arg1: i32, %arg2: i32) -> (i32, i32, i32) {
    %c1_i32 = arith.constant 1 : i32
    %0 = arith.muli %arg1, %c1_i32 : i32
    %1 = arith.addi %0, %arg2 : i32
    %c0_i32 = arith.constant 0 : i32
    %2 = arith.minsi %1, %c0_i32 : i32
    %c0_i32_0 = arith.constant 0 : i32
    %c0_i32_1 = arith.constant 0 : i32
    return %arg0, %2, %c0_i32_0 : i32, i32, i32
  }
  func.func @transform_2(%arg0: i32, %arg1: i32, %arg2: i32) -> (i32, i32, i32, i32) {
    %c0_i32 = arith.constant 0 : i32
    %c0_i32_0 = arith.constant 0 : i32
    %c0_i32_1 = arith.constant 0 : i32
    return %arg0, %arg1, %c0_i32, %c0_i32_0 : i32, i32, i32, i32
  }
  func.func @transform_3(%arg0: i32, %arg1: i32, %arg2: i32) -> (i32, i32, i32, i32) {
    %c0_i32 = arith.constant 0 : i32
    %c0_i32_0 = arith.constant 0 : i32
    %c0_i32_1 = arith.constant 0 : i32
    return %arg0, %arg1, %c0_i32, %c0_i32_0 : i32, i32, i32, i32
  }
}

</mosaic_0001>

<bundles_post_ra>
// kernel: tpu_custom_call.1
= control target key start
LH: loop header
LB: loop body
LE: loop exit
PB: predicated region body
PF: predicated region fallthrough
CT: control target
= control target key end

     0   :  { %9 = vsyncpa [#allocation3], 0  ;;  %s1058_s0 = inlined_call_operand.hbm [shape: f32[2,5,2,128], index: 0, kind: input, shape index: {}]   ;;  %s1059_s1 = inlined_call_operand.hbm [shape: s32[2,2,128], index: 1, kind: input, shape index: {}]   ;;  %s1060_s2 = inlined_call_operand.hbm [shape: f32[2,1,8,128], index: 2, kind: output, shape index: {0}]   ;;  %s1061_s3 = inlined_call_operand.hbm [shape: f32[2,1,8,128], index: 3, kind: output, shape index: {1}]  }
   0x1   :  { %11 = vsyncpa [#allocation3 + $0x1], 0 }
   0x2   :  { %12 = vsyncpa [#allocation6], 0 }
   0x3   :  { %14 = vsyncpa [#allocation6 + $0x1], 0 }
   0x4   :  { %15 = vsyncpa [#allocation4], 0 }
   0x5   :  { %17 = vsyncpa [#allocation4 + $0x1], 0 }
   0x6   :  { %18 = vsyncpa [#allocation9], 0 }
   0x7   :  { %20 = vsyncpa [#allocation9 + $0x1], 0  ;;  %s869_s12 = smov 0   ;;  %s871_s13 = smov 0  }
   0x8   :  { %s873_s14 = smov 0   ;;  %s875_s15 = smov 0  }
   0x9   :  { %s877_s16 = smov 0   ;;  %s879_s17 = smov 0  }
   0xa LB: > { %s591_s18 = sadd.s32 4294967295, %s836_s17   ;;  %s592_s19 = sadd.s32 4294967294, %s836_s17   ;;  %s836_s17 = sphi %s879_s17, %s26_s17   ;;  %s832_s16 = sphi %s877_s16, %s1070_s16   ;;  %s828_s15 = sphi %s875_s15, %s1069_s15   ;;  %s824_s14 = sphi %s873_s14, %s1068_s14   ;;  %s820_s13 = sphi %s871_s13, %s1067_s13   ;;  %s816_s12 = sphi %s869_s12, %s1066_s12  }
   0xb   : > { %s45_s20 = sadd.s32 1, %s832_s16  ;;  %s60_s21 = sadd.s32 1, %s824_s14 }
   0xc   : > { %p47_p0 = scmp.ge.s32.totalorder %s45_s20, 2  ;;  %p67_p1 = scmp.ne.s32.totalorder %s824_s14, %s820_s13 }
   0xd   : > { %p68_p2 = scmp.eq.s32.totalorder %s836_s17, 0  ;;  %p73_p3 = scmp.ne.s32.totalorder %s820_s13, %s816_s12 }
   0xe   : > { %s1072_s20 = smov (%p47_p0, %s45_s20), 0  ;;  %p74_p5 = scmp.eq.s32.totalorder %s591_s18, 0 }
   0xf   : > { %p910_p4 = por %p68_p2, %p67_p1  ;;  %s55_s23 = ssub.s32 %s832_s16, %s1072_s20 }
  0x10   : > { %p133_p6 = scmp.eq.s32.totalorder %s591_s18, 1  ;;  %p58_p7 = scmp.eq.s32.totalorder %s55_s23, 0 }
  0x11   : > { %p916_p8 = por %p74_p5, %p73_p3  ;;  %p139_p10 = scmp.eq.s32.totalorder %s592_s19, 1 }
  0x12   : > { %p920_p9 = por %p133_p6, %p67_p1  ;;  %p594_p12 = scmp.ge.s32.totalorder %s836_s17, 2 }
  0x13   : > { %s925_s26 = scalar_select %p58_p7, %s824_s14, %s60_s21  }
  0x14   : > { %p927_p11 = por %p139_p10, %p73_p3  ;;  %183 = sbr.rel (%p594_p12) target bundleno = 63 (0x3f), region = 16 }
  0x19   : > { %186 = sbr.rel (!%p910_p4) target bundleno = 44 (0x2c), region = 20 }
  0x1e   : > { %s187_s28 = sand.u32 1, %s824_s14  }
  0x1f   : > { %s610_s29 = smul.u32 40, %s187_s28  ;;  %s188_s30 = scalar_lea.sflag [#allocation3], %s187_s28 }
  0x21   : > { %s191_s4 = scalar_lea.vmem [#allocation2], %s610_s29 }
  0x22   : > { %200 = vsyncadd %s188_s30, 480  ;;  %s611_s5 = smul.u32 160, %s832_s16  ;;  %s212_s6 = sld [smem:[#allocation0]]  }
  0x23   : > { %s220_s7 = sshll.u32 %s191_s4, 4  ;;  %s838_s11 = smov 32   ;;  %s221_s7 = int_to_ptr.vmem [resolvable:$true] %s220_s7 }
  0x24   : > { %s205_s10 = scalar_lea.hbm %s1058_s0, %s611_s5  ;;  %227 = sst [smem:[#allocation11]] %s838_s11 }
  0x25   : > { %s839_s18 = smov 128   ;;  %s840_s19 = smov 1  }
  0x26   : > { %229 = sst [smem:[#allocation11 + $0x1]] %s839_s18  ;;  %s841_s28 = smov 2  }
  0x27   : > { %231 = sst [smem:[#allocation11 + $0x2]] %s840_s19  ;;  %s842_s29 = smov 131072  }
  0x28   : > { %s596_s21 = sshll.u32 %s212_s6, 26  ;;  %233 = sst [smem:[#allocation11 + $0x3]] %s838_s11 }
  0x29   : > { %s597_s23 = sadd.s32 134217728, %s596_s21  ;;  %235 = sst [smem:[#allocation11 + $0x4]] %s838_s11 }
  0x2a   : > { %237 = sst [smem:[#allocation11 + $0x5]] %s841_s28 }
  0x2b   : > { %239 = dma.general %s205_s10, 160, %s221_s7, %s188_s30, %s842_s29, [#allocation11], %s597_s23, 0  }
  0x2c PF: > { %242 = sbr.rel (!%p910_p4) target bundleno = 63 (0x3f), region = 24  ;;  %s243_s4 = sand.u32 (%p910_p4), 1, %s824_s14  }
  0x2d   : > { %s598_s5 = sshll.u32 (%p910_p4), %s243_s4, 3  ;;  %s244_s8 = scalar_lea.sflag (%p910_p4), [#allocation6], %s243_s4 }
  0x2e   : > { %s247_s9 = scalar_lea.vmem (%p910_p4), [#allocation5], %s598_s5 }
  0x31   : > { %256 = vsyncadd %s244_s8, 96  ;;  %s599_s18 = sshll.u32 %s832_s16, 5  ;;  %s262_s6 = sshll.u32 %s247_s9, 4  ;;  %s263_s6 = int_to_ptr.vmem [resolvable:$true] %s262_s6 }
  0x32   : > { %s260_s11 = scalar_lea.hbm %s1059_s1, %s599_s18  ;;  %s710_s28 = scalar_lea.vmem %s263_s6, 32 }
  0x33   : > { %p711_p13 = scmp.ne.s32.totalorder %s263_s6, %s710_s28  ;;  %s843_s30 = smov [#allocation5]  }
  0x34   : > { %s712_s7 = sshll.u32 %s843_s30, 4  ;;  %s713_s7 = int_to_ptr.vmem [resolvable:$false] %s712_s7 }
  0x35   : > { %s714_s22 = scalar_lea.vmem %s713_s7, 256  ;;  %p715_p0 = scmp.lt.s32.totalorder %s263_s6, %s713_s7 }
  0x36   : > { %p716_p1 = scmp.lt.s32.totalorder %s714_s22, %s710_s28 }
  0x38   : > { %p717_p2 = por %p716_p1, %p715_p0 }
  0x3a   : > { %p718_p3 = pnand %p717_p2, %p711_p13 }
  0x3c   : > { %721 = shalt.err (!%p718_p3)
}
  0x3d   : > { %s844_s10 = smov 32   ;;  %s845_s23 = smov 2  }
  0x3e   : > { %268 = dma.hbm_to_vmem [thread:$0]  %s260_s11, 32, %s263_s6, %s244_s8, %s844_s10, %s844_s10, %s845_s23  }
  0x3f PF: > { %p600_p4 = scmp.ge.s32.totalorder %s836_s17, 1  ;;  %p270_p5 = scmp.lt.s32.totalorder %s836_s17, 3 }
  0x41   : > { %p271_p6 = pnand %p600_p4, %p270_p5 }
  0x42   : > { %s951_s29 = sand.u32 (!%p271_p6), 1, %s820_s13  }
  0x43   : > { %274 = sbr.rel (%p271_p6) target bundleno = 201 (0xc9), region = 28  ;;  %s277_s5 = scalar_lea.sflag (!%p271_p6), [#allocation3], %s951_s29 }
  0x44   : > { %s612_s4 = smul.u32 (!%p271_p6), 40, %s951_s29 }
  0x46   : > { %s280_s9 = scalar_lea.vmem (!%p271_p6), [#allocation2], %s612_s4 }
  0x48   : > { %799 = dma.done.wait (%p916_p8), %s277_s5, 640  }
  0x49   : > { %801 = vsyncadd (%p916_p8), %s277_s5, 4294966656  ;;  %s960_s8 = sshll.u32 %s951_s29, 3  ;;  %s286_s18 = scalar_lea.sflag [#allocation6], %s951_s29 }
  0x4a   : > { %s289_s6 = scalar_lea.vmem [#allocation5], %s960_s8 }
  0x4b   : > { %803 = dma.done.wait (%p916_p8), %s286_s18, 128  }
  0x4c   : > { %805 = vsyncadd (%p916_p8), %s286_s18, 4294967168  ;;  %v340_v0 = vld [vmem:[%s280_s9] sm:$0xff]  ;;  %v341_v1 = vld [vmem:[%s280_s9 + $0x8] sm:$0xff]  ;;  %v846_v40 = vmov 1.0   ;;  %v395_v45 = vlaneseq  ;;  %s606_s24 = sshll.u32 %s828_s15, 7  ;;  %s321_s19 = scalar_lea.vmem [#allocation8], %s960_s8 }
  0x4d   : > { %v342_v2 = vld [vmem:[%s280_s9 + $0x10] sm:$0xff]  ;;  %v343_v3 = vld [vmem:[%s280_s9 + $0x18] sm:$0xff]  ;;  %v344_v4 = vld [vmem:[%s280_s9 + $0x20] sm:$0xff]  ;;  %s448_s21 = sshll.u32 %s321_s19, 4  ;;  %s314_s11 = scalar_lea.vmem [#allocation7], %s960_s8  ;;  %s982_s21 = int_to_ptr.vmem [resolvable:$true] %s448_s21 }
  0x4e   : > { %v345_v5 = vld [vmem:[%s289_s6] sm:$0xff]  ;;  %v346_v6 = vmax.f32 %v340_v0, %v344_v4  ;;  %v348_v7 = vmax.f32 %v342_v2, %v343_v3  ;;  %v396_v47 = vshrl.u32 %v395_v45, 7  ;;  %v398_v48 = vand.u32 127, %v395_v45  ;;  %s434_s28 = sshll.u32 %s314_s11, 4  ;;  %s980_s22 = scalar_lea.hbm %s1061_s3, %s606_s24  ;;  %s989_s28 = int_to_ptr.vmem [resolvable:$true] %s434_s28 }
  0x4f   : > { %vm371_vm0 = vcmp.eq.s32.totalorder %v345_v5, 0  ;;  %vm373_vm1 = vcmp.eq.s32.totalorder %v345_v5, 1  ;;  %vm376_vm2 = vcmp.eq.s32.totalorder %v345_v5, 2  ;;  %vm381_vm3 = vcmp.eq.s32.totalorder %v345_v5, 4  ;;  %s987_s23 = scalar_lea.hbm %s1060_s2, %s606_s24  ;;  %s420_s4 = scalar_lea.sflag [#allocation9], %s951_s29 }
  0x50   : > { %v372_v8 = vsel %vm371_vm0, %v340_v0, 0.0  ;;  %v347_v9 = vmax.f32 %v346_v6, %v341_v1  ;;  %vm378_vm4 = vcmp.eq.s32.totalorder %v345_v5, 3  ;;  %v375_v41 = vsel %vm373_vm1, 2.0, %v846_v40  ;;  %s722_s5 = scalar_lea.vmem %s982_s21, 128  ;;  %s847_s9 = smov [#allocation8]  }
  0x51   : > { %v374_v10 = vsel %vm373_vm1, %v341_v1, %v372_v8  ;;  %v380_v42 = vsel %vm378_vm4, 2.0, %v375_v41  ;;  %v402_v49 = vmul.u32 128, %v396_v47  ;;  %p723_p7 = scmp.ne.s32.totalorder %s982_s21, %s722_s5  ;;  %s726_s18 = sshll.u32 %s847_s9, 4  ;;  %s727_s18 = int_to_ptr.vmem [resolvable:$false] %s726_s18 }
  0x52   : > { %v377_v11 = vsel %vm376_vm2, %v342_v2, %v374_v10  ;;  %v349_v12 = vmax.f32 %v347_v9, %v348_v7  ;;  %s728_s6 = scalar_lea.vmem %s727_s18, 256  ;;  %p729_p13 = scmp.lt.s32.totalorder %s982_s21, %s727_s18 }
  0x53   : > { %v379_v13 = vsel %vm378_vm4, %v343_v3, %v377_v11  ;;  %v403_v51 = vadd.s32 %v402_v49, %v398_v48  ;;  %p724_p8 = pnand %p723_p7, %p920_p9  ;;  %p730_p0 = scmp.lt.s32.totalorder %s728_s6, %s722_s5 }
  0x54   : > { %v382_v14 = vsel %vm381_vm3, %v344_v4, %v379_v13  ;;  %v350_v15 = vsub.f32 %v340_v0, %v349_v12  ;;  %v351_v16 = vsub.f32 %v341_v1, %v349_v12  ;;  %v352_v17 = vsub.f32 %v342_v2, %v349_v12 }
  0x55   : > { %v353_v18 = vsub.f32 %v343_v3, %v349_v12  ;;  %v354_v19 = vsub.f32 %v344_v4, %v349_v12  ;;  %vm404_vm6 = vcmp.lt.s32.totalorder %v403_v51, 256  ;;  %p725_p10 = pneg %p724_p8  ;;  %p731_p1 = por %p730_p0, %p729_p13 }
  0x56   : > { %v355_v20 = vmul.f32 1.442695, %v350_v15  ;;  %v357_v21 = vmul.f32 1.442695, %v351_v16  ;;  %v359_v22 = vmul.f32 1.442695, %v352_v17 }
  0x57   : > { %v361_v23 = vmul.f32 1.442695, %v353_v18  ;;  %v363_v24 = vmul.f32 1.442695, %v354_v19  ;;  %p732_p2 = pnand %p731_p1, %p725_p10 }
  0x58   : > { %684 = vpow2.f32 %v355_v20 }
  0x59   : > { %686 = vpow2.f32 %v357_v21 }
  0x5a   : > { %688 = vpow2.f32 %v359_v22 }
  0x5b   : > { %690 = vpow2.f32 %v361_v23 }
  0x5c   : > { %692 = vpow2.f32 %v363_v24 }
  0x65   : > { %v685_v25 = vpop.eup %684 }
  0x66   : > { %v687_v26 = vpop.eup %686 }
  0x67   : > { %v689_v27 = vpop.eup %688  ;;  %v365_v28 = vadd.f32 %v687_v26, %v685_v25 }
  0x68   : > { %v691_v29 = vpop.eup %690 }
  0x69   : > { %v366_v30 = vadd.f32 %v689_v27, %v365_v28  ;;  %v693_v31 = vpop.eup %692 }
  0x6b   : > { %v367_v32 = vadd.f32 %v691_v29, %v366_v30 }
  0x6d   : > { %v368_v33 = vadd.f32 %v693_v31, %v367_v32 }
  0x6f   : > { %694 = vlog2.f32 %v368_v33  ;;  %v388_v50 = vmul.f32 0.95, %v368_v33 }
  0x71   : > { %vm389_vm5 = vcmp.lt.f32.partialorder %v685_v25, %v388_v50 }
  0x7c   : > { %v695_v34 = vpop.eup %694 }
  0x7d   : > { %v370_v35 = vmul.f32 0.6931472, %v695_v34 }
  0x7f   : > { %v383_v36 = vadd.f32 %v370_v35, %v349_v12  ;;  %v385_v37 = vsub.f32 %v350_v15, %v370_v35 }
  0x81   : > { %v384_v38 = vsub.f32 %v383_v36, %v382_v14  ;;  %v386_v39 = vmul.f32 1.442695, %v385_v37 }
  0x83   : > { %696 = vpow2.f32 %v386_v39 }
  0x90   : > { %v697_v43 = vpop.eup %696 }
  0x91   : > { %v390_v44 = vsub.f32 %v380_v42, %v697_v43 }
  0x93   : > { %v391_v46 = vmul.f32 1.442695, %v390_v44 }
  0x95   : > { %698 = vpow2.f32 %v391_v46 }
  0xa2   : > { %v699_v52 = vpop.eup %698 }
  0xa3   : > { %v393_v53 = vsel %vm389_vm5, %v699_v52, 0.0 }
  0xa4   : > { %v405_v54 = vmul.f32 %v393_v53, %v384_v38  ;;  %v407_v55 = vsel %vm404_vm6, %v393_v53, 0.0 }
  0xa5   : > { %413 = vst [vmem:[%s321_s19] sm:$0xff] %v407_v55 }
  0xa6   : > { %v406_v56 = vsel %vm404_vm6, %v405_v54, 0.0 }
  0xa7   : > { %735 = shalt.err (!%p732_p2)
}
  0xa8   : > { %s736_s24 = scalar_lea.hbm %s980_s22, 128  ;;  %s740_s7 = scalar_lea.hbm %s1061_s3, 256 }
  0xa9   : > { %p737_p3 = scmp.ne.s32.totalorder %s980_s22, %s736_s24  ;;  %p741_p6 = scmp.lt.s32.totalorder %s980_s22, %s1061_s3 }
  0xaa   : > { %p742_p7 = scmp.lt.s32.totalorder %s740_s7, %s736_s24 }
  0xab   : > { %p738_p4 = pnand %p737_p3, %p920_p9 }
  0xac   : > { %p743_p8 = por %p742_p7, %p741_p6 }
  0xad   : > { %p739_p5 = pneg %p738_p4 }
  0xaf   : > { %p744_p10 = pnand %p743_p8, %p739_p5 }
  0xb1   : > { %747 = shalt.err (!%p744_p10)
}
  0xb2   : > { %616 = dma.vmem_to_hbm [thread:$0]  (%p920_p9), %s982_s21, 128, %s980_s22, %s420_s4   ;;  %410 = vst [vmem:[%s314_s11] sm:$0xff] %v406_v56 }
  0xb3   : > { %s415_s5 = scalar_lea.sflag [#allocation4], %s951_s29  ;;  %s748_s9 = scalar_lea.vmem %s989_s28, 128 }
  0xb4   : > { %p749_p13 = scmp.ne.s32.totalorder %s989_s28, %s748_s9  ;;  %s848_s18 = smov [#allocation7]  }
  0xb5   : > { %s752_s6 = sshll.u32 %s848_s18, 4  ;;  %s753_s6 = int_to_ptr.vmem [resolvable:$false] %s752_s6 }
  0xb6   : > { %p750_p0 = pnand %p749_p13, %p920_p9  ;;  %s754_s24 = scalar_lea.vmem %s753_s6, 256 }
  0xb7   : > { %p755_p2 = scmp.lt.s32.totalorder %s989_s28, %s753_s6  ;;  %p756_p3 = scmp.lt.s32.totalorder %s754_s24, %s748_s9 }
  0xb8   : > { %p751_p1 = pneg %p750_p0 }
  0xb9   : > { %p757_p4 = por %p756_p3, %p755_p2 }
  0xbb   : > { %p758_p5 = pnand %p757_p4, %p751_p1 }
  0xbd   : > { %761 = shalt.err (!%p758_p5)
}
  0xbe   : > { %s762_s8 = scalar_lea.hbm %s987_s23, 128  ;;  %s766_s11 = scalar_lea.hbm %s1060_s2, 256 }
  0xbf   : > { %p763_p6 = scmp.ne.s32.totalorder %s987_s23, %s762_s8  ;;  %p767_p10 = scmp.lt.s32.totalorder %s987_s23, %s1060_s2 }
  0xc0   : > { %p768_p13 = scmp.lt.s32.totalorder %s766_s11, %s762_s8 }
  0xc1   : > { %p764_p7 = pnand %p763_p6, %p920_p9 }
  0xc2   : > { %p769_p0 = por %p768_p13, %p767_p10 }
  0xc3   : > { %p765_p8 = pneg %p764_p7 }
  0xc5   : > { %p770_p1 = pnand %p769_p0, %p765_p8 }
  0xc7   : > { %773 = shalt.err (!%p770_p1)
}
  0xc8   : > { %615 = dma.vmem_to_hbm [thread:$0]  (%p920_p9), %s989_s28, 128, %s987_s23, %s415_s5  }
  0xc9 PF: > { %s460_s19 = sand.u32 1, %s816_s12   ;;  %p620_p2 = pnand %p594_p12, %p927_p11 }
  0xca   : > { %s461_s30 = scalar_lea.sflag [#allocation4], %s460_s19 }
  0xcb   : > { %p621_p3 = pneg %p620_p2 }
  0xcd   : > { %807 = dma.done.wait (%p621_p3), %s461_s30, 128  }
  0xce   : > { %809 = vsyncadd (%p621_p3), %s461_s30, 4294967168  ;;  %s470_s7 = scalar_lea.sflag [#allocation9], %s460_s19 }
  0xcf   : > { %811 = dma.done.wait (%p621_p3), %s470_s7, 128  }
  0xd0   : > { %813 = vsyncadd (%p621_p3), %s470_s7, 4294967168  ;;  %s26_s17 = sadd.s32 1, %s836_s17   ;;  %s1066_s12 = smov %s820_s13 }
  0xd1   : > { %p23_p4 = scmp.ge.s32.totalorder %s26_s17, 4   ;;  %s1067_s13 = smov %s824_s14 }
  0xd2   : > { %s1068_s14 = smov %s925_s26  ;;  %s1069_s15 = smov %s832_s16 }
  0xd3   : > { %s1070_s16 = smov %s1072_s20  ;;  %25 = sbr.rel (!%p23_p4) target bundleno = 10 (0xa), region = 112 }
  0xd8   :  { %475 = vsyncpa [#allocation3], 1 }
  0xd9   :  { %477 = vsyncpa [#allocation3 + $0x1], 1 }
  0xda   :  { %478 = vsyncpa [#allocation6], 1 }
  0xdb   :  { %480 = vsyncpa [#allocation6 + $0x1], 1 }
  0xdc   :  { %481 = vsyncpa [#allocation4], 1 }
  0xdd   :  { %483 = vsyncpa [#allocation4 + $0x1], 1 }
  0xde   :  { %484 = vsyncpa [#allocation9], 1 }
  0xdf   :  { %486 = vsyncpa [#allocation9 + $0x1], 1 }

</bundles_post_ra>
